<compile_context>
chip_gen: v7x
topology: tpu7x:2x2x1
jax: 0.10.0
libtpu: 0.0.40
codegen_flags: <defaults>
</compile_context>

<pallas_src>
import jax
import jax.numpy as jnp
from jax.experimental import pallas as pl
from jax.experimental.pallas import tpu as pltpu


def _round_up(x, m):
    return ((x + m - 1) // m) * m


def _largest_divisor_leq(n, cap):
    cap = max(1, min(n, cap))
    for d in range(cap, 0, -1):
        if n % d == 0:
            return d
    return 1


def _fsp_partial_kernel(s1_ref, s2_ref, t1_ref, t2_ref, part_ref):
    """One batch-tile: un-normalized FSP Gram matrices, squared-diff partial sum."""
    s1 = s1_ref[...]   # (TB, C1p, HWp)
    s2 = s2_ref[...]   # (TB, C2p, HWp)
    t1 = t1_ref[...]   # (TB, C1p, HWp)
    t2 = t2_ref[...]   # (TB, C2p, HWp)

    # Contraction over the last (lane) dim of both operands -> MXU, no transpose.
    gs = jnp.einsum("bcx,bdx->bcd", s1, s2, preferred_element_type=jnp.float32)
    gt = jnp.einsum("bcx,bdx->bcd", t1, t2, preferred_element_type=jnp.float32)

    d = gs - gt                      # un-normalized (scale folded in outside)
    partial = jnp.sum(d * d)         # scalar partial for this batch tile

    # Lane-dense full-tile store; wrapper reads element [g, 0, 0].
    part_ref[...] = jnp.full(part_ref.shape, partial, dtype=part_ref.dtype)


def _adaptive_avg_pool_to(x, out_h, out_w):
    """F.adaptive_avg_pool2d for the divisible case (reshape + mean)."""
    b, c, h, w = x.shape
    if h == out_h and w == out_w:
        return x
    # TODO(synk): non-divisible adaptive pooling (overlapping windows) not implemented.
    assert h % out_h == 0 and w % out_w == 0
    x = x.reshape(b, c, out_h, h // out_h, out_w, w // out_w)
    return x.mean(axis=(3, 5))


def _prep_pair(fm1, fm2):
    """Mirror FSP.fsp_matrix's pre-processing: pool fm1 if larger, flatten spatial."""
    if fm1.shape[2] > fm2.shape[2]:
        fm1 = _adaptive_avg_pool_to(fm1, fm2.shape[2], fm2.shape[3])
    b, c1, h, w = fm1.shape
    c2 = fm2.shape[1]
    return fm1.reshape(b, c1, h * w), fm2.reshape(b, c2, h * w)


def fsp_loss(fm_s1, fm_s2, fm_t1, fm_t2, *, vmem_budget_bytes=24 * 1024 * 1024):
    s1, s2 = _prep_pair(fm_s1, fm_s2)
    t1, t2 = _prep_pair(fm_t1, fm_t2)

    B, C1, HW = s1.shape
    C2 = s2.shape[1]
    assert t1.shape == (B, C1, HW) and t2.shape == (B, C2, HW), \
        "student/teacher FSP matrices must have matching shapes for MSE"

    # Zero-pad: lanes (HW) to 128, sublanes (C) to 8. Zero rows/cols contribute
    # nothing to either Gram matrix, so the squared-error sum is unchanged.
    # (No-op when shapes are already aligned, which is the common FSP case.)
    C1p = _round_up(C1, 8)
    C2p = _round_up(C2, 8)
    HWp = _round_up(HW, 128)

    def _pad_chw(x, cp):
        b, c, hw = x.shape
        if c == cp and hw == HWp:
            return x
        return jnp.pad(x, ((0, 0), (0, cp - c), (0, HWp - hw)))

    s1, t1 = _pad_chw(s1, C1p), _pad_chw(t1, C1p)
    s2, t2 = _pad_chw(s2, C2p), _pad_chw(t2, C2p)

    # Batch-tile size: fit (double-buffered inputs + matmul intermediates) in a
    # v7x-safe VMEM budget, and pick the largest such TB that divides B so no
    # batch padding / wasted MXU work is ever needed.
    itemsize = jnp.dtype(s1.dtype).itemsize
    in_bytes_per_b = (C1p + C2p) * HWp * itemsize * 2          # student + teacher
    inter_bytes_per_b = 3 * C1p * C2p * 4                      # gs, gt, d (f32)
    denom = 2 * in_bytes_per_b + inter_bytes_per_b             # x2 = pipeline buffers
    max_tb = int(max(1, vmem_budget_bytes // max(1, denom)))
    TB = _largest_divisor_leq(B, max_tb)
    G = B // TB

    # VMEM limit: leave headroom; raise above the 32 MiB default only if a single
    # batch element alone exceeds the budget (TB == 1 forced).
    needed = TB * denom + (64 << 10)
    vmem_limit = int(min(64 * 1024 * 1024, max(32 * 1024 * 1024, needed + (4 << 20))))

    partials = pl.pallas_call(
        _fsp_partial_kernel,
        out_shape=jax.ShapeDtypeStruct((G, 8, 128), jnp.float32),
        grid_spec=pltpu.PrefetchScalarGridSpec(
            num_scalar_prefetch=0,
            grid=(G,),
            in_specs=[
                pl.BlockSpec((TB, C1p, HWp), lambda g: (g, 0, 0)),
                pl.BlockSpec((TB, C2p, HWp), lambda g: (g, 0, 0)),
                pl.BlockSpec((TB, C1p, HWp), lambda g: (g, 0, 0)),
                pl.BlockSpec((TB, C2p, HWp), lambda g: (g, 0, 0)),
            ],
            out_specs=pl.BlockSpec((1, 8, 128), lambda g: (g, 0, 0)),
        ),
        compiler_params=pltpu.CompilerParams(
            dimension_semantics=("parallel",),        # independent batch tiles
            vmem_limit_bytes=vmem_limit,
        ),
    )(s1, s2, t1, t2)

    # Fold the /HW of both FSP matrices and the MSE mean into one final scale.
    scale = 1.0 / (float(HW) * float(HW) * float(B) * float(C1) * float(C2))
    return jnp.sum(partials[:, 0, 0]) * scale


def fsp_loss_ref(fm_s1, fm_s2, fm_t1, fm_t2):
    """Pure-JAX reference mirroring the PyTorch module."""
    def fsp_matrix(fm1, fm2):
        f1, f2 = _prep_pair(fm1, fm2)
        hw = f1.shape[2]
        return jnp.einsum("bcx,bdx->bcd", f1, f2) / hw

    a = fsp_matrix(fm_s1, fm_s2)
    b = fsp_matrix(fm_t1, fm_t2)
    return jnp.mean((a - b) ** 2)


if __name__ == "__main__":
    key = jax.random.PRNGKey(0)
    k1, k2, k3, k4 = jax.random.split(key, 4)
    # Student pair: 16x16 -> pooled to match 8x8; teacher pair likewise.
    fm_s1 = jax.random.normal(k1, (2, 4, 16, 16), dtype=jnp.float32)
    fm_s2 = jax.random.normal(k2, (2, 8, 8, 8), dtype=jnp.float32)
    fm_t1 = jax.random.normal(k3, (2, 4, 16, 16), dtype=jnp.float32)
    fm_t2 = jax.random.normal(k4, (2, 8, 8, 8), dtype=jnp.float32)

    out = jax.block_until_ready(fsp_loss(fm_s1, fm_s2, fm_t1, fm_t2))
    ref = fsp_loss_ref(fm_s1, fm_s2, fm_t1, fm_t2)
    assert jnp.allclose(out, ref, rtol=1e-5, atol=1e-6), (out, ref)
    print("KERNEL_OK")
</pallas_src>

<mosaic_0001>
module attributes {stable_mosaic.version = 11 : i64} {
  func.func @_fsp_partial_kernel(%arg0: i32, %arg1: memref<2x8x128xf32, #tpu.memory_space<vmem>>, %arg2: memref<2x8x128xf32, #tpu.memory_space<vmem>>, %arg3: memref<2x8x128xf32, #tpu.memory_space<vmem>>, %arg4: memref<2x8x128xf32, #tpu.memory_space<vmem>>, %arg5: memref<1x8x128xf32, #tpu.memory_space<vmem>>) attributes {dimension_semantics = [#tpu.dimension_semantics<parallel>], iteration_bounds = array<i64: 1>, scalar_prefetch = 0 : i64, scratch_operands = 0 : i64, tpu.core_type = #tpu.core_type<tc>, window_params = [{transform_indices = @transform_0, window_bounds = array<i64: 2, 8, 128>}, {transform_indices = @transform_1, window_bounds = array<i64: 2, 8, 128>}, {transform_indices = @transform_2, window_bounds = array<i64: 2, 8, 128>}, {transform_indices = @transform_3, window_bounds = array<i64: 2, 8, 128>}, {transform_indices = @transform_4, window_bounds = array<i64: 1, 8, 128>}]} {
    %c0 = arith.constant 0 : index
    %c0_0 = arith.constant 0 : index
    %c0_1 = arith.constant 0 : index
    %0 = vector.load %arg1[%c0, %c0_0, %c0_1] : memref<2x8x128xf32, #tpu.memory_space<vmem>>, vector<2x8x128xf32>
    %c0_2 = arith.constant 0 : index
    %c0_3 = arith.constant 0 : index
    %c0_4 = arith.constant 0 : index
    %1 = vector.load %arg2[%c0_2, %c0_3, %c0_4] : memref<2x8x128xf32, #tpu.memory_space<vmem>>, vector<2x8x128xf32>
    %c0_5 = arith.constant 0 : index
    %c0_6 = arith.constant 0 : index
    %c0_7 = arith.constant 0 : index
    %2 = vector.load %arg3[%c0_5, %c0_6, %c0_7] : memref<2x8x128xf32, #tpu.memory_space<vmem>>, vector<2x8x128xf32>
    %c0_8 = arith.constant 0 : index
    %c0_9 = arith.constant 0 : index
    %c0_10 = arith.constant 0 : index
    %3 = vector.load %arg4[%c0_8, %c0_9, %c0_10] : memref<2x8x128xf32, #tpu.memory_space<vmem>>, vector<2x8x128xf32>
    "tpu.trace_start"() <{level = 10 : i32, message = "bcx,bdx->bcd"}> : () -> ()
    %cst = arith.constant dense<0.000000e+00> : vector<2x8x8xf32>
    %4 = tpu.matmul %0, %1, %cst {dimension_numbers = #tpu.dot_dimension_numbers<[2], [2], [1], [1], [0, 0, 0, 1, 1, 1], [0], [0]>} : vector<2x8x128xf32>, vector<2x8x128xf32>, vector<2x8x8xf32> -> vector<2x8x8xf32>
    %cst_11 = arith.constant dense<0.000000e+00> : vector<2x8x8xf32>
    %5 = tpu.matmul %2, %3, %cst_11 {dimension_numbers = #tpu.dot_dimension_numbers<[2], [2], [1], [1], [0, 0, 0, 1, 1, 1], [0], [0]>} : vector<2x8x128xf32>, vector<2x8x128xf32>, vector<2x8x8xf32> -> vector<2x8x8xf32>
    "tpu.trace_stop"() : () -> ()
    %6 = arith.subf %4, %5 : vector<2x8x8xf32>
    %7 = arith.mulf %6, %6 : vector<2x8x8xf32>
    %8 = vector.shape_cast %7 : vector<2x8x8xf32> to vector<1x2x8x8xf32>
    %cst_12 = arith.constant dense<0.000000e+00> : vector<1xf32>
    %9 = vector.multi_reduction <add>, %8, %cst_12 [1, 2, 3] : vector<1x2x8x8xf32> to vector<1xf32>
    %10 = vector.shape_cast %9 : vector<1xf32> to vector<1x1x1x1xf32>
    %11 = vector.extract %10[0, 0, 0, 0] : f32 from vector<1x1x1x1xf32>
    %12 = vector.broadcast %11 : f32 to vector<1x8x128xf32>
    %c0_13 = arith.constant 0 : index
    %c0_14 = arith.constant 0 : index
    %c0_15 = arith.constant 0 : index
    %13 = vector.load %arg5[%c0_13, %c0_14, %c0_15] : memref<1x8x128xf32, #tpu.memory_space<vmem>>, vector<1x8x128xf32>
    tpu.vector_store %arg5[%c0_13, %c0_14, %c0_15], %12 {strides = array<i32>} : memref<1x8x128xf32, #tpu.memory_space<vmem>>, vector<1x8x128xf32>,
    return
  }
  func.func @transform_0(%arg0: i32) -> (i32, i32, i32) {
    %c0_i32 = arith.constant 0 : i32
    %c0_i32_0 = arith.constant 0 : i32
    %c0_i32_1 = arith.constant 0 : i32
    return %arg0, %c0_i32, %c0_i32_0 : i32, i32, i32
  }
  func.func @transform_1(%arg0: i32) -> (i32, i32, i32) {
    %c0_i32 = arith.constant 0 : i32
    %c0_i32_0 = arith.constant 0 : i32
    %c0_i32_1 = arith.constant 0 : i32
    return %arg0, %c0_i32, %c0_i32_0 : i32, i32, i32
  }
  func.func @transform_2(%arg0: i32) -> (i32, i32, i32) {
    %c0_i32 = arith.constant 0 : i32
    %c0_i32_0 = arith.constant 0 : i32
    %c0_i32_1 = arith.constant 0 : i32
    return %arg0, %c0_i32, %c0_i32_0 : i32, i32, i32
  }
  func.func @transform_3(%arg0: i32) -> (i32, i32, i32) {
    %c0_i32 = arith.constant 0 : i32
    %c0_i32_0 = arith.constant 0 : i32
    %c0_i32_1 = arith.constant 0 : i32
    return %arg0, %c0_i32, %c0_i32_0 : i32, i32, i32
  }
  func.func @transform_4(%arg0: i32) -> (i32, i32, i32) {
    %c0_i32 = arith.constant 0 : i32
    %c0_i32_0 = arith.constant 0 : i32
    %c0_i32_1 = arith.constant 0 : i32
    return %arg0, %c0_i32, %c0_i32_0 : i32, i32, i32
  }
}

</mosaic_0001>

<bundles_post_ra>
// kernel: tpu_custom_call.1
= control target key start
LH: loop header
LB: loop body
LE: loop exit
PB: predicated region body
PF: predicated region fallthrough
CT: control target
= control target key end

     0   :  { %9 = vsyncpa [#allocation3], 0  ;;  %s678_s0 = inlined_call_operand.hbm [shape: f32[2,8,128], index: 0, kind: input, shape index: {}]   ;;  %s679_s1 = inlined_call_operand.hbm [shape: f32[2,8,128], index: 1, kind: input, shape index: {}]   ;;  %s680_s2 = inlined_call_operand.hbm [shape: f32[2,8,128], index: 2, kind: input, shape index: {}]   ;;  %s681_s3 = inlined_call_operand.hbm [shape: f32[2,8,128], index: 3, kind: input, shape index: {}]   ;;  %s682_s4 = inlined_call_operand.hbm [shape: f32[1,8,128], index: 4, kind: output, shape index: {}]  }
   0x1   :  { %10 = vsyncpa [#allocation6], 0 }
   0x2   :  { %11 = vsyncpa [#allocation9], 0 }
   0x3   :  { %12 = vsyncpa [#allocation4], 0  ;;  %s554_s15 = smov [#allocation5]   ;;  %s555_s17 = smov [#allocation2]  }
   0x4   :  { %s30_s16 = sshll.u32 %s554_s15, 4  ;;  %s18_s18 = sshll.u32 %s555_s17, 4  ;;  %s31_s16 = int_to_ptr.vmem [resolvable:$true] %s30_s16  ;;  %s588_s18 = int_to_ptr.vmem [resolvable:$true] %s18_s18 }
   0x5   :  { %s436_s21 = scalar_lea.hbm %s679_s1, 256 }
   0x6   :  { %p437_p0 = scmp.ne.s32.totalorder %s679_s1, %s436_s21  ;;  %p440_p1 = scmp.lt.u32.totalorder %s436_s21, %s679_s1 }
   0x8   :  { %p442_p2 = pnand %p440_p1, %p437_p0 }
   0xa   :  { %445 = shalt.err (!%p442_p2)
}
   0xb   :  { %s446_s26 = scalar_lea.vmem %s31_s16, 256  ;;  %p451_p4 = scmp.lt.s32.totalorder %s31_s16, %s31_s16 }
   0xc   :  { %p447_p3 = scmp.ne.s32.totalorder %s31_s16, %s446_s26  ;;  %p452_p5 = scmp.lt.s32.totalorder %s446_s26, %s446_s26 }
   0xe   :  { %p453_p6 = por %p452_p5, %p451_p4 }
  0x10   :  { %p454_p7 = pnand %p453_p6, %p447_p3 }
  0x12   :  { %457 = shalt.err (!%p454_p7)
}
  0x13   :  { %s556_s27 = smov 128   ;;  %s557_s28 = smov 8  }
  0x14   :  { %36 = dma.hbm_to_vmem [thread:$0]  %s679_s1, 256, %s31_s16, [#allocation6], %s556_s27, %s556_s27, %s557_s28  }
  0x15   :  { %s458_s7 = scalar_lea.hbm %s678_s0, 256 }
  0x16   :  { %p459_p8 = scmp.ne.s32.totalorder %s678_s0, %s458_s7  ;;  %p462_p9 = scmp.lt.u32.totalorder %s458_s7, %s678_s0 }
  0x18   :  { %p464_p10 = pnand %p462_p9, %p459_p8 }
  0x1a   :  { %467 = shalt.err (!%p464_p10)
}
  0x1b   :  { %s468_s12 = scalar_lea.vmem %s588_s18, 256  ;;  %p473_p12 = scmp.lt.s32.totalorder %s588_s18, %s588_s18 }
  0x1c   :  { %p469_p11 = scmp.ne.s32.totalorder %s588_s18, %s468_s12  ;;  %p474_p13 = scmp.lt.s32.totalorder %s468_s12, %s468_s12 }
  0x1e   :  { %p475_p0 = por %p474_p13, %p473_p12 }
  0x20   :  { %p476_p1 = pnand %p475_p0, %p469_p11 }
  0x22   :  { %479 = shalt.err (!%p476_p1)
}
  0x23   :  { %24 = dma.hbm_to_vmem [thread:$0]  %s678_s0, 256, %s588_s18, [#allocation3], %s556_s27, %s556_s27, %s557_s28  }
  0x24   :  { %s558_s14 = smov [#allocation7]   ;;  %s559_s16 = smov [#allocation8]  }
  0x25   :  { %s42_s15 = sshll.u32 %s558_s14, 4  ;;  %s54_s17 = sshll.u32 %s559_s16, 4  ;;  %s43_s15 = int_to_ptr.vmem [resolvable:$true] %s42_s15  ;;  %s625_s17 = int_to_ptr.vmem [resolvable:$true] %s54_s17 }
  0x26   :  { %s480_s21 = scalar_lea.hbm %s680_s2, 256 }
  0x27   :  { %p481_p2 = scmp.ne.s32.totalorder %s680_s2, %s480_s21  ;;  %p484_p3 = scmp.lt.u32.totalorder %s480_s21, %s680_s2 }
  0x29   :  { %p486_p4 = pnand %p484_p3, %p481_p2 }
  0x2b   :  { %489 = shalt.err (!%p486_p4)
}
  0x2c   :  { %s490_s0 = scalar_lea.vmem %s43_s15, 256  ;;  %p495_p6 = scmp.lt.s32.totalorder %s43_s15, %s43_s15 }
  0x2d   :  { %p491_p5 = scmp.ne.s32.totalorder %s43_s15, %s490_s0  ;;  %p496_p7 = scmp.lt.s32.totalorder %s490_s0, %s490_s0 }
  0x2f   :  { %p497_p8 = por %p496_p7, %p495_p6 }
  0x31   :  { %p498_p9 = pnand %p497_p8, %p491_p5 }
  0x33   :  { %501 = shalt.err (!%p498_p9)
}
  0x34   :  { %48 = dma.hbm_to_vmem [thread:$0]  %s680_s2, 256, %s43_s15, [#allocation6], %s556_s27, %s556_s27, %s557_s28  }
  0x35   :  { %s502_s5 = scalar_lea.hbm %s681_s3, 256 }
  0x36   :  { %p503_p10 = scmp.ne.s32.totalorder %s681_s3, %s502_s5  ;;  %p506_p11 = scmp.lt.u32.totalorder %s502_s5, %s681_s3 }
  0x38   :  { %p508_p12 = pnand %p506_p11, %p503_p10 }
  0x3a   :  { %511 = shalt.err (!%p508_p12)
}
  0x3b   :  { %s512_s10 = scalar_lea.vmem %s625_s17, 256  ;;  %p517_p0 = scmp.lt.s32.totalorder %s625_s17, %s625_s17 }
  0x3c   :  { %p513_p13 = scmp.ne.s32.totalorder %s625_s17, %s512_s10  ;;  %p518_p1 = scmp.lt.s32.totalorder %s512_s10, %s512_s10 }
  0x3e   :  { %p519_p2 = por %p518_p1, %p517_p0 }
  0x40   :  { %p520_p3 = pnand %p519_p2, %p513_p13 }
  0x42   :  { %523 = shalt.err (!%p520_p3)
}
  0x43   :  { %60 = dma.hbm_to_vmem [thread:$0]  %s681_s3, 256, %s625_s17, [#allocation9], %s556_s27, %s556_s27, %s557_s28  }
  0x44   :  { %546 = dma.done.wait [#allocation3], 256  }
  0x45   :  { %547 = vsyncadd [#allocation3], 4294967040 }
  0x46   :  { %548 = dma.done.wait [#allocation6], 512  }
  0x47   :  { %549 = vsyncadd [#allocation6], 4294966784 }
  0x48   :  { %550 = dma.done.wait [#allocation9], 256  }
  0x49   :  { %551 = vsyncadd [#allocation9], 4294967040  ;;  %v560_v0 = vmov 0.0   ;;  %vm561_vm0 = vmmov 0   ;;  %v75_v1 = vld [vmem:[#allocation5] sm:$0xff]  ;;  %v76_v2 = vld [vmem:[#allocation5 + $0x8] sm:$0xff] }
  0x4a   :  { %405 = vmatprep.subr.mxu0 %v560_v0  ;;  %410 = vmatprep.subr.mxu1 %v560_v0  ;;  %v73_v3 = vld [vmem:[#allocation2] sm:$0xff]  ;;  %v74_v4 = vld [vmem:[#allocation2 + $0x8] sm:$0xff]  ;;  %v79_v5 = vld [vmem:[#allocation8] sm:$0xff]  ;;  %vm365_vm1 = vcmask 64512   ;;  %s562_s3 = smov [#allocation10]  }
  0x4b   :  { %407 = vmatprep.mubr.msk.f32.mxu0 %vm561_vm0, %v560_v0  ;;  %412 = vmatprep.mubr.msk.f32.mxu1 %vm561_vm0, %v560_v0  ;;  %v80_v6 = vld [vmem:[#allocation8 + $0x8] sm:$0xff]  ;;  %v77_v7 = vld [vmem:[#allocation7] sm:$0xff]  ;;  %v78_v8 = vld [vmem:[#allocation7 + $0x8] sm:$0xff]  ;;  %s386_s27 = sshll.u32 %s562_s3, 4  ;;  %s387_s27 = int_to_ptr.vmem [resolvable:$true] %s386_s27 }
  0x4c   :  { %406 = vmatpush3.xpose.msra.mxu0 %v75_v1  ;;  %411 = vmatpush3.xpose.msra.mxu1 %v76_v2  ;;  %s524_s12 = scalar_lea.vmem %s387_s27, 128  ;;  %p529_p5 = scmp.lt.s32.totalorder %s387_s27, %s387_s27 }
  0x4d   :  { %415 = vmatprep.subr.mxu0 %v560_v0  ;;  %420 = vmatprep.subr.mxu1 %v560_v0  ;;  %p525_p4 = scmp.ne.s32.totalorder %s387_s27, %s524_s12  ;;  %p530_p6 = scmp.lt.s32.totalorder %s524_s12, %s524_s12 }
  0x4f   :  { %408 = vmatmul.mubr.f32.vlgmr.msra.gmra.mrb[0].mxu0 %v73_v3  ;;  %413 = vmatmul.mubr.f32.vlgmr.msra.gmra.mrb[0].mxu1 %v74_v4  ;;  %p531_p7 = por %p530_p6, %p529_p5 }
  0x50   :  { %416 = vmatpush3.xpose.msra.mxu0 %v79_v5  ;;  %421 = vmatpush3.xpose.msra.mxu1 %v80_v6 }
  0x51   :  { %417 = vmatprep.mubr.msk.f32.mxu0 %vm561_vm0, %v560_v0  ;;  %422 = vmatprep.mubr.msk.f32.mxu1 %vm561_vm0, %v560_v0  ;;  %p532_p8 = pnand %p531_p7, %p525_p4 }
  0x53   :  { %418 = vmatmul.mubr.f32.vlgmr.msra.gmra.mrb[2].mxu0 %v77_v7  ;;  %423 = vmatmul.mubr.f32.vlgmr.msra.gmra.mrb[2].mxu1 %v78_v8 }
 0x122   :  { %v147_v9 = vpop.f32.mrb[0].mxu0  ;;  %v217_v10 = vpop.f32.mrb[0].mxu1 }
 0x123   :  { %v409_v11 = vpop.f32.mrb[1].mxu0  ;;  %v414_v12 = vpop.f32.mrb[1].mxu1 }
 0x126   :  { %v287_v13 = vpop.f32.mrb[2].mxu0  ;;  %v357_v14 = vpop.f32.mrb[2].mxu1 }
 0x127   :  { %v361_v15 = vsub.f32 %v147_v9, %v287_v13  ;;  %v362_v16 = vsub.f32 %v217_v10, %v357_v14  ;;  %v419_v17 = vpop.f32.mrb[3].mxu0  ;;  %v424_v18 = vpop.f32.mrb[3].mxu1 }
 0x129   :  { %v363_v19 = vmul.f32 %v361_v15, %v361_v15  ;;  %v364_v20 = vmul.f32 %v362_v16, %v362_v16 }
 0x12b   :  { %v366_v21 = vsel %vm365_vm1, %v363_v19, 0.0  ;;  %v367_v22 = vsel %vm365_vm1, %v364_v20, 0.0 }
 0x12c   :  { %v368_v23 = vadd.f32 %v367_v22, %v366_v21 }
 0x12e   :  { %369 = vadd.xlane.f32.xlu0 %v368_v23 }
 0x1bb   :  { %v370_v24 = vpop.xlane.xlu0 %369 }
 0x1bc   :  { %v371_v25 = vrot.slane %v370_v24, 4 }
 0x1be   :  { %v372_v26 = vadd.f32 %v371_v25, %v370_v24 }
 0x1c0   :  { %v373_v27 = vrot.slane %v372_v26, 2 }
 0x1c2   :  { %v374_v28 = vadd.f32 %v373_v27, %v372_v26 }
 0x1c4   :  { %v375_v29 = vrot.slane %v374_v28, 1 }
 0x1c6   :  { %v376_v30 = vadd.f32 %v375_v29, %v374_v28 }
 0x1c8   :  { %425 = vpush %v376_v30 }
 0x1f9   :  { %s426_s28 = spop %425 }
 0x1fa   :  { %v378_v31 = vstv %s426_s28 }
 0x1fb   :  { %379 = vst [vmem:[#allocation10] sm:$0xff] %v378_v31 }
 0x1fc   :  { %535 = shalt.err (!%p532_p8)
}
 0x1fd   :  { %s536_s14 = scalar_lea.hbm %s682_s4, 128 }
 0x1fe   :  { %p537_p9 = scmp.ne.s32.totalorder %s682_s4, %s536_s14  ;;  %p540_p10 = scmp.lt.u32.totalorder %s536_s14, %s682_s4 }
 0x200   :  { %p542_p11 = pnand %p540_p10, %p537_p9 }
 0x202   :  { %545 = shalt.err (!%p542_p11)
}
 0x203   :  { %389 = dma.vmem_to_hbm [thread:$0]  %s387_s27, 128, %s682_s4, [#allocation4]  }
 0x204   :  { %552 = dma.done.wait [#allocation4], 128  }
 0x205   :  { %553 = vsyncadd [#allocation4], 4294967168 }
 0x206   :  { %393 = vsyncpa [#allocation3], 1 }
 0x207   :  { %394 = vsyncpa [#allocation6], 1 }
 0x208   :  { %395 = vsyncpa [#allocation9], 1 }
 0x209   :  { %396 = vsyncpa [#allocation4], 1 }

</bundles_post_ra>
